<compile_context>
chip_gen: v7x
topology: tpu7x:2x2x1
jax: 0.10.0
libtpu: 0.0.40
codegen_flags: <defaults>
</compile_context>

<pallas_src>
import functools
import numpy as np
import jax
import jax.numpy as jnp
from jax.experimental import pallas as pl
from jax.experimental.pallas import tpu as pltpu

_MIB = 1024 * 1024


def _self_attention_kernel(x_ref, wqkv_ref, wproj_ref, bproj_ref, o_ref, *,
                           weights_resident):
    qi = pl.program_id(1)
    h = pl.program_id(2)
    num_h = pl.num_programs(2)

    @pl.when(h == 0)
    def _init():
        o_ref[...] = jnp.zeros_like(o_ref)

    Bt, N, Cp = x_ref.shape
    Nq = o_ref.shape[1]

    if weights_resident:
        # All-head weights VMEM-resident; pick this head's columns in-kernel.
        def w_cols(lo, hi):
            return wqkv_ref[h, :, lo:hi]
        w_proj_h = wproj_ref[h]
    else:
        # One head's weights streamed per grid step (Squeezed head dim).
        def w_cols(lo, hi):
            return wqkv_ref[:, lo:hi]
        w_proj_h = wproj_ref[...]

    x_all = x_ref[...].reshape(Bt * N, Cp)                       # (Bt*N, Cp) bf16
    if Nq == N:
        x_q = x_all
    else:
        q0 = pl.multiple_of(qi * Nq, Nq)
        x_q = x_ref[:, pl.ds(q0, Nq), :].reshape(Bt * Nq, Cp)

    # Three lane-aligned MXU dots (f32 accumulation, immediate bf16 cast).
    # The attention scale is already folded into the q weight columns.
    q = jnp.dot(x_q, w_cols(0, Cp),
                preferred_element_type=jnp.float32).astype(jnp.bfloat16)
    k = jnp.dot(x_all, w_cols(Cp, 2 * Cp),
                preferred_element_type=jnp.float32).astype(jnp.bfloat16)
    v = jnp.dot(x_all, w_cols(2 * Cp, 3 * Cp),
                preferred_element_type=jnp.float32).astype(jnp.bfloat16)
    q = q.reshape(Bt, Nq, Cp)
    k = k.reshape(Bt, N, Cp)
    v = v.reshape(Bt, N, Cp)

    # Scores: contraction on the last dim — no transpose / XLU relayout.
    # TODO(synk): for long N, add a kv grid axis with online softmax (flash-style)
    # so the (Nq, N) score tile never materializes (needed ~2x earlier on v7x).
    s = jnp.einsum('bqc,bkc->bqk', q, k, preferred_element_type=jnp.float32)
    s = s - jnp.max(s, axis=-1, keepdims=True)
    p = jnp.exp(s)
    p = p * pl.reciprocal(jnp.sum(p, axis=-1, keepdims=True), approx=True)

    pv = jnp.einsum('bqk,bkc->bqc', p.astype(jnp.bfloat16), v,
                    preferred_element_type=jnp.float32)          # (Bt, Nq, Cp) f32

    # Per-head output projection, accumulated into the VMEM-resident output block.
    y_h = jnp.dot(pv.reshape(Bt * Nq, Cp).astype(jnp.bfloat16), w_proj_h,
                  preferred_element_type=jnp.float32).reshape(Bt, Nq, Cp)
    o_ref[...] += y_h

    @pl.when(h == num_h - 1)
    def _finalize():
        o_ref[...] += bproj_ref[...]                             # (1, Cp) broadcast


def _vmem_capacity_bytes():
    try:
        info = pltpu.get_tpu_info()
        cap = getattr(info, "vmem_capacity_bytes", None)
        if cap:
            return int(cap)
    except Exception:
        pass
    return 64 * _MIB      # conservative fallback (v7x-sized)


def _estimate_vmem_bytes(block_b, block_q, N, Cp, H, resident):
    """Rough per-grid-step working set: pipeline buffers + in-kernel intermediates."""
    bf16, f32 = 2, 4
    x_blk = 2 * block_b * N * Cp * bf16                          # double-buffered input
    if resident:
        w = H * 4 * Cp * Cp * bf16                               # all heads, one copy
    else:
        w = 2 * 4 * Cp * Cp * bf16                               # one head, double-buffered
    out_blk = 2 * block_b * block_q * Cp * f32
    inter = block_b * ((block_q + 2 * N) * Cp * bf16             # q, k, v
                       + block_q * N * (f32 + bf16)              # scores + probs
                       + 2 * block_q * Cp * f32)                 # pv, y_h
    return x_blk + w + out_blk + inter + (1 * _MIB)              # slack


def prepare_self_attention_params(w_qkv, w_proj, b_proj, *, num_heads):
    """One-time weight re-layout — do this once and reuse across calls.

    w_qkv: (C, 3*H*C)  nn.Linear weight transposed for right-multiplication.
    w_proj: (H*C, C);  b_proj: (1, C).
    Pads channels to a lane multiple (128), splits weights per head, folds the
    attention scale into the q columns, and casts weights to bf16.
    """
    C = w_qkv.shape[0]
    H = num_heads
    head_dim = C // H
    scale = float(head_dim) ** (-0.5)
    Cp = ((C + 127) // 128) * 128

    wq = jnp.asarray(w_qkv, jnp.float32).reshape(C, 3, H, C).transpose(2, 0, 1, 3)
    wq = wq.at[:, :, 0, :].multiply(scale)                       # fold scale into q
    wq = jnp.pad(wq, ((0, 0), (0, Cp - C), (0, 0), (0, Cp - C)))
    wq = wq.reshape(H, Cp, 3 * Cp).astype(jnp.bfloat16)          # (H, Cp, 3*Cp)

    wp = jnp.asarray(w_proj, jnp.float32).reshape(H, C, C)
    wp = jnp.pad(wp, ((0, 0), (0, Cp - C), (0, Cp - C))).astype(jnp.bfloat16)

    bp = jnp.pad(jnp.asarray(b_proj, jnp.float32), ((0, 0), (0, Cp - C)))
    return {"wqkv": wq, "wproj": wp, "bproj": bp, "C": C, "Cp": Cp, "H": H}


def self_attention(x, params, *, mask=None, block_b=None, block_q=None,
                   weights_resident=None):
    """x: (B, N, C); params from prepare_self_attention_params."""
    B, N, C = x.shape
    H, Cp = params["H"], params["Cp"]
    assert C == params["C"]
    assert N % 16 == 0, "sequence length must be a multiple of 16 (bf16 sublanes)"
    # TODO(synk): for ragged N, pad the sequence and mask padded key columns to -inf
    # before the softmax (zero-padded keys would otherwise pollute the softmax).

    # --- VMEM budget (generation-aware: ~96 MiB v5e/v6e, ~48 MiB v7x) ---
    capacity = _vmem_capacity_bytes()
    vmem_limit = int(min(100 * _MIB, 0.75 * capacity))
    budget = int(0.85 * vmem_limit)

    if weights_resident is None:
        weights_resident = (H * 4 * Cp * Cp * 2) <= 0.6 * budget

    # --- batch block: prefer >=2 grid steps, capped by the VMEM budget ---
    if block_b is None:
        cap = max(1, min(8, B // 2)) if B >= 2 else 1
        block_b = 1
        for d in range(cap, 0, -1):
            if B % d == 0 and _estimate_vmem_bytes(
                    d, N, N, Cp, H, weights_resident) <= budget:
                block_b = d
                break
    assert B % block_b == 0
    grid_b = B // block_b

    # --- query-row block: opens a second "parallel" axis when grid_b == 1 (v7x has
    #     two TensorCores) and shrinks the (Nq, N) score tile under the budget ---
    if block_q is None:
        block_q = N
        if grid_b == 1 and N >= 32 and (N // 2) % 16 == 0:
            block_q = N // 2
        while (block_q >= 32 and (block_q // 2) % 16 == 0
               and _estimate_vmem_bytes(block_b, block_q, N, Cp, H,
                                        weights_resident) > budget):
            block_q //= 2
    assert N % block_q == 0 and block_q % 8 == 0
    grid_q = N // block_q

    # --- lane-dense channel padding of the activations ---
    x_p = jnp.pad(x, ((0, 0), (0, 0), (0, Cp - C))).astype(jnp.bfloat16)

    if weights_resident:
        wqkv_spec = pl.BlockSpec((H, Cp, 3 * Cp), lambda b, qi, h: (0, 0, 0))
        wproj_spec = pl.BlockSpec((H, Cp, Cp), lambda b, qi, h: (0, 0, 0))
    else:
        wqkv_spec = pl.BlockSpec((pl.Squeezed(), Cp, 3 * Cp),
                                 lambda b, qi, h: (h, 0, 0))
        wproj_spec = pl.BlockSpec((pl.Squeezed(), Cp, Cp),
                                  lambda b, qi, h: (h, 0, 0))

    kernel = functools.partial(_self_attention_kernel,
                               weights_resident=weights_resident)

    out_p = pl.pallas_call(
        kernel,
        out_shape=jax.ShapeDtypeStruct((B, N, Cp), jnp.float32),
        grid_spec=pltpu.PrefetchScalarGridSpec(
            num_scalar_prefetch=0,
            grid=(grid_b, grid_q, H),
            in_specs=[
                pl.BlockSpec((block_b, N, Cp), lambda b, qi, h: (b, 0, 0)),   # x
                wqkv_spec,                                                    # W_qkv
                wproj_spec,                                                   # W_proj
                pl.BlockSpec((1, Cp), lambda b, qi, h: (0, 0)),               # b_proj
            ],
            out_specs=pl.BlockSpec((block_b, block_q, Cp),
                                   lambda b, qi, h: (b, qi, 0)),
        ),
        compiler_params=pltpu.CompilerParams(
            dimension_semantics=("parallel", "parallel", "arbitrary"),
            vmem_limit_bytes=vmem_limit),
    )(x_p, params["wqkv"], params["wproj"], params["bproj"])

    out = out_p[:, :, :C]

    attn_mask = None
    if mask is not None:
        # repeat(mask, 'b n -> b n a', a=C) — glue; the mask never affects attention
        # in the original module (faithful to the PyTorch quirk).
        attn_mask = jnp.broadcast_to(mask[:, :, None], (B, N, C))
    return out, attn_mask


def _reference(x, w_qkv, w_proj, b_proj, num_heads):
    B, N, C = x.shape
    H = num_heads
    scale = float(C // H) ** (-0.5)
    qkv = jnp.einsum('bnc,cd->bnd', x, w_qkv)                    # (B, N, 3*H*C)
    qkv = qkv.reshape(B, N, 3, H, C).transpose(2, 0, 3, 1, 4)    # (3, B, H, N, C)
    q, k, v = qkv[0], qkv[1], qkv[2]
    attn = jnp.einsum('bhnc,bhmc->bhnm', q, k) * scale
    attn = jax.nn.softmax(attn, axis=-1)
    out = jnp.einsum('bhnm,bhmc->bhnc', attn, v)                 # (B, H, N, C)
    out = out.transpose(0, 2, 1, 3).reshape(B, N, H * C)
    return jnp.einsum('bnd,dc->bnc', out, w_proj) + b_proj[0]


if __name__ == "__main__":
    dim, num_heads = 32, 2

    key = jax.random.PRNGKey(0)
    kx1, kx2, kqkv, kproj, kb = jax.random.split(key, 5)

    # Deterministic synthetic nn.Linear parameters (stored transposed for x @ W).
    w_qkv = jax.random.normal(kqkv, (dim, 3 * num_heads * dim), jnp.float32) * 0.05
    w_proj = jax.random.normal(kproj, (num_heads * dim, dim), jnp.float32) * 0.05
    b_proj = jax.random.normal(kb, (1, dim), jnp.float32) * 0.01

    # One-time weight re-layout, amortized across all calls.
    params = prepare_self_attention_params(w_qkv, w_proj, b_proj,
                                           num_heads=num_heads)

    # Case 1: batched — batch axis feeds the "parallel" grid.
    x1 = jax.random.normal(kx1, (2, 16, dim), jnp.float32)
    out1, _ = self_attention(x1, params)
    out1 = jax.block_until_ready(out1)
    ref1 = _reference(x1, w_qkv, w_proj, b_proj, num_heads)
    np.testing.assert_allclose(np.asarray(out1), np.asarray(ref1),
                               rtol=2e-2, atol=2e-2)

    # Case 2: B == 1 — exercises the query-row "parallel" axis (v7x second core).
    x2 = jax.random.normal(kx2, (1, 32, dim), jnp.float32)
    out2, _ = self_attention(x2, params)
    out2 = jax.block_until_ready(out2)
    ref2 = _reference(x2, w_qkv, w_proj, b_proj, num_heads)
    np.testing.assert_allclose(np.asarray(out2), np.asarray(ref2),
                               rtol=2e-2, atol=2e-2)

    # Case 3: streamed per-head weights path (Squeezed head dim), as used when the
    # all-head weight set exceeds the VMEM budget (large models / v7x), plus mask glue.
    out3, attn_mask = self_attention(x1, params, weights_resident=False,
                                     mask=jnp.ones((2, 16), dtype=bool))
    out3 = jax.block_until_ready(out3)
    np.testing.assert_allclose(np.asarray(out3), np.asarray(ref1),
                               rtol=2e-2, atol=2e-2)
    assert attn_mask.shape == (2, 16, dim)

    print("KERNEL_OK")
</pallas_src>

<mosaic_0001>
module attributes {stable_mosaic.version = 11 : i64} {
  func.func @_self_attention_kernel(%arg0: i32, %arg1: i32, %arg2: i32, %arg3: memref<1x16x128xbf16, #tpu.memory_space<vmem>>, %arg4: memref<2x128x384xbf16, #tpu.memory_space<vmem>>, %arg5: memref<2x128x128xbf16, #tpu.memory_space<vmem>>, %arg6: memref<1x128xf32, #tpu.memory_space<vmem>>, %arg7: memref<1x16x128xf32, #tpu.memory_space<vmem>>) attributes {dimension_semantics = [#tpu.dimension_semantics<parallel>, #tpu.dimension_semantics<parallel>, #tpu.dimension_semantics<arbitrary>], iteration_bounds = array<i64: 2, 1, 2>, scalar_prefetch = 0 : i64, scratch_operands = 0 : i64, tpu.core_type = #tpu.core_type<tc>, window_params = [{transform_indices = @transform_0, window_bounds = array<i64: 1, 16, 128>}, {pipeline_mode = #tpu.pipeline_mode<synchronous>, transform_indices = @transform_1, window_bounds = array<i64: 2, 128, 384>}, {pipeline_mode = #tpu.pipeline_mode<synchronous>, transform_indices = @transform_2, window_bounds = array<i64: 2, 128, 128>}, {pipeline_mode = #tpu.pipeline_mode<synchronous>, transform_indices = @transform_3, window_bounds = array<i64: 1, 128>}, {transform_indices = @transform_4, window_bounds = array<i64: 1, 16, 128>}]} {
    %c0_i32 = arith.constant 0 : i32
    %0 = arith.cmpi eq, %arg2, %c0_i32 : i32
    %1 = arith.extui %0 : i1 to i32
    %c0_i32_0 = arith.constant 0 : i32
    %2 = arith.cmpi ne, %1, %c0_i32_0 : i32
    scf.if %2 {
      %cst_23 = arith.constant 0.000000e+00 : f32
      %49 = vector.broadcast %cst_23 : f32 to vector<1x16x128xf32>
      %c0_24 = arith.constant 0 : index
      %c0_25 = arith.constant 0 : index
      %c0_26 = arith.constant 0 : index
      %50 = vector.load %arg7[%c0_24, %c0_25, %c0_26] : memref<1x16x128xf32, #tpu.memory_space<vmem>>, vector<1x16x128xf32>
      tpu.vector_store %arg7[%c0_24, %c0_25, %c0_26], %49 {strides = array<i32>} : memref<1x16x128xf32, #tpu.memory_space<vmem>>, vector<1x16x128xf32>,
    } else {
    }
    %3 = arith.index_cast %arg2 : i32 to index
    %c0 = arith.constant 0 : index
    %c0_1 = arith.constant 0 : index
    %4 = vector.load %arg5[%3, %c0, %c0_1] : memref<2x128x128xbf16, #tpu.memory_space<vmem>>, vector<1x128x128xbf16>
    %5 = vector.shape_cast %4 : vector<1x128x128xbf16> to vector<128x128xbf16>
    %c0_2 = arith.constant 0 : index
    %c0_3 = arith.constant 0 : index
    %c0_4 = arith.constant 0 : index
    %6 = vector.load %arg3[%c0_2, %c0_3, %c0_4] : memref<1x16x128xbf16, #tpu.memory_space<vmem>>, vector<1x16x128xbf16>
    %7 = vector.shape_cast %6 : vector<1x16x128xbf16> to vector<16x128xbf16>
    %8 = arith.index_cast %arg2 : i32 to index
    %c0_5 = arith.constant 0 : index
    %c0_6 = arith.constant 0 : index
    %9 = vector.load %arg4[%8, %c0_5, %c0_6] : memref<2x128x384xbf16, #tpu.memory_space<vmem>>, vector<1x128x128xbf16>
    %10 = vector.shape_cast %9 : vector<1x128x128xbf16> to vector<128x128xbf16>
    %cst = arith.constant dense<0.000000e+00> : vector<16x128xf32>
    %11 = tpu.matmul %7, %10, %cst {dimension_numbers = #tpu.dot_dimension_numbers<[1], [0], [0], [1], [0, 0, 1, 1], [], []>} : vector<16x128xbf16>, vector<128x128xbf16>, vector<16x128xf32> -> vector<16x128xf32>
    %12 = arith.truncf %11 : vector<16x128xf32> to vector<16x128xbf16>
    %13 = arith.index_cast %arg2 : i32 to index
    %c0_7 = arith.constant 0 : index
    %c128 = arith.constant 128 : index
    %14 = vector.load %arg4[%13, %c0_7, %c128] : memref<2x128x384xbf16, #tpu.memory_space<vmem>>, vector<1x128x128xbf16>
    %15 = vector.shape_cast %14 : vector<1x128x128xbf16> to vector<128x128xbf16>
    %cst_8 = arith.constant dense<0.000000e+00> : vector<16x128xf32>
    %16 = tpu.matmul %7, %15, %cst_8 {dimension_numbers = #tpu.dot_dimension_numbers<[1], [0], [0], [1], [0, 0, 1, 1], [], []>} : vector<16x128xbf16>, vector<128x128xbf16>, vector<16x128xf32> -> vector<16x128xf32>
    %17 = arith.truncf %16 : vector<16x128xf32> to vector<16x128xbf16>
    %18 = arith.index_cast %arg2 : i32 to index
    %c0_9 = arith.constant 0 : index
    %c256 = arith.constant 256 : index
    %19 = vector.load %arg4[%18, %c0_9, %c256] : memref<2x128x384xbf16, #tpu.memory_space<vmem>>, vector<1x128x128xbf16>
    %20 = vector.shape_cast %19 : vector<1x128x128xbf16> to vector<128x128xbf16>
    %cst_10 = arith.constant dense<0.000000e+00> : vector<16x128xf32>
    %21 = tpu.matmul %7, %20, %cst_10 {dimension_numbers = #tpu.dot_dimension_numbers<[1], [0], [0], [1], [0, 0, 1, 1], [], []>} : vector<16x128xbf16>, vector<128x128xbf16>, vector<16x128xf32> -> vector<16x128xf32>
    %22 = arith.truncf %21 : vector<16x128xf32> to vector<16x128xbf16>
    %23 = vector.shape_cast %12 : vector<16x128xbf16> to vector<1x16x128xbf16>
    %24 = vector.shape_cast %17 : vector<16x128xbf16> to vector<1x16x128xbf16>
    %25 = vector.shape_cast %22 : vector<16x128xbf16> to vector<1x16x128xbf16>
    "tpu.trace_start"() <{level = 10 : i32, message = "bqc,bkc->bqk"}> : () -> ()
    %cst_11 = arith.constant dense<0.000000e+00> : vector<1x16x16xf32>
    %26 = tpu.matmul %23, %24, %cst_11 {dimension_numbers = #tpu.dot_dimension_numbers<[2], [2], [1], [1], [0, 0, 0, 1, 1, 1], [0], [0]>} : vector<1x16x128xbf16>, vector<1x16x128xbf16>, vector<1x16x16xf32> -> vector<1x16x16xf32>
    "tpu.trace_stop"() : () -> ()
    %cst_12 = arith.constant dense<0xFF800000> : vector<1x16xf32>
    %27 = vector.multi_reduction <maximumf>, %26, %cst_12 [2] : vector<1x16x16xf32> to vector<1x16xf32>
    %28 = vector.shape_cast %27 : vector<1x16xf32> to vector<1x16x1xf32>
    %29 = vector.broadcast %28 : vector<1x16x1xf32> to vector<1x16x16xf32>
    %30 = arith.subf %26, %29 : vector<1x16x16xf32>
    %31 = math.exp %30 : vector<1x16x16xf32>
    %cst_13 = arith.constant dense<0.000000e+00> : vector<1x16xf32>
    %32 = vector.multi_reduction <add>, %31, %cst_13 [2] : vector<1x16x16xf32> to vector<1x16xf32>
    %33 = vector.shape_cast %32 : vector<1x16xf32> to vector<1x16x1xf32>
    %34 = tpu.reciprocal %33 {approx = true} : vector<1x16x1xf32> -> vector<1x16x1xf32>
    %35 = vector.broadcast %34 : vector<1x16x1xf32> to vector<1x16x16xf32>
    %36 = arith.mulf %31, %35 : vector<1x16x16xf32>
    %37 = arith.truncf %36 : vector<1x16x16xf32> to vector<1x16x16xbf16>
    "tpu.trace_start"() <{level = 10 : i32, message = "bqk,bkc->bqc"}> : () -> ()
    %cst_14 = arith.constant dense<0.000000e+00> : vector<1x16x128xf32>
    %38 = tpu.matmul %37, %25, %cst_14 {dimension_numbers = #tpu.dot_dimension_numbers<[2], [1], [1], [2], [0, 0, 0, 1, 1, 2], [0], [0]>} : vector<1x16x16xbf16>, vector<1x16x128xbf16>, vector<1x16x128xf32> -> vector<1x16x128xf32>
    "tpu.trace_stop"() : () -> ()
    %39 = vector.shape_cast %38 : vector<1x16x128xf32> to vector<16x128xf32>
    %40 = arith.truncf %39 : vector<16x128xf32> to vector<16x128xbf16>
    %cst_15 = arith.constant dense<0.000000e+00> : vector<16x128xf32>
    %41 = tpu.matmul %40, %5, %cst_15 {dimension_numbers = #tpu.dot_dimension_numbers<[1], [0], [0], [1], [0, 0, 1, 1], [], []>} : vector<16x128xbf16>, vector<128x128xbf16>, vector<16x128xf32> -> vector<16x128xf32>
    %42 = vector.shape_cast %41 : vector<16x128xf32> to vector<1x16x128xf32>
    %c0_16 = arith.constant 0 : index
    %c0_17 = arith.constant 0 : index
    %c0_18 = arith.constant 0 : index
    %43 = vector.load %arg7[%c0_16, %c0_17, %c0_18] : memref<1x16x128xf32, #tpu.memory_space<vmem>>, vector<1x16x128xf32>
    %44 = arith.addf %43, %42 : vector<1x16x128xf32>
    %c0_19 = arith.constant 0 : index
    %c0_20 = arith.constant 0 : index
    %c0_21 = arith.constant 0 : index
    %45 = vector.load %arg7[%c0_19, %c0_20, %c0_21] : memref<1x16x128xf32, #tpu.memory_space<vmem>>, vector<1x16x128xf32>
    tpu.vector_store %arg7[%c0_19, %c0_20, %c0_21], %44 {strides = array<i32>} : memref<1x16x128xf32, #tpu.memory_space<vmem>>, vector<1x16x128xf32>,
    %c1_i32 = arith.constant 1 : i32
    %46 = arith.cmpi eq, %arg2, %c1_i32 : i32
    %47 = arith.extui %46 : i1 to i32
    %c0_i32_22 = arith.constant 0 : i32
    %48 = arith.cmpi ne, %47, %c0_i32_22 : i32
    scf.if %48 {
      %c0_23 = arith.constant 0 : index
      %c0_24 = arith.constant 0 : index
      %c0_25 = arith.constant 0 : index
      %49 = vector.load %arg7[%c0_23, %c0_24, %c0_25] : memref<1x16x128xf32, #tpu.memory_space<vmem>>, vector<1x16x128xf32>
      %c0_26 = arith.constant 0 : index
      %c0_27 = arith.constant 0 : index
      %50 = vector.load %arg6[%c0_26, %c0_27] : memref<1x128xf32, #tpu.memory_space<vmem>>, vector<1x128xf32>
      %51 = vector.shape_cast %50 : vector<1x128xf32> to vector<1x1x128xf32>
      %52 = vector.broadcast %51 : vector<1x1x128xf32> to vector<1x16x128xf32>
      %53 = arith.addf %49, %52 : vector<1x16x128xf32>
      %c0_28 = arith.constant 0 : index
      %c0_29 = arith.constant 0 : index
      %c0_30 = arith.constant 0 : index
      %54 = vector.load %arg7[%c0_28, %c0_29, %c0_30] : memref<1x16x128xf32, #tpu.memory_space<vmem>>, vector<1x16x128xf32>
      tpu.vector_store %arg7[%c0_28, %c0_29, %c0_30], %53 {strides = array<i32>} : memref<1x16x128xf32, #tpu.memory_space<vmem>>, vector<1x16x128xf32>,
    } else {
    }
    return
  }
  func.func @transform_0(%arg0: i32, %arg1: i32, %arg2: i32) -> (i32, i32, i32) {
    %c0_i32 = arith.constant 0 : i32
    %c0_i32_0 = arith.constant 0 : i32
    %c0_i32_1 = arith.constant 0 : i32
    return %arg0, %c0_i32, %c0_i32_0 : i32, i32, i32
  }
  func.func @transform_1(%arg0: i32, %arg1: i32, %arg2: i32) -> (i32, i32, i32) {
    %c0_i32 = arith.constant 0 : i32
    %c0_i32_0 = arith.constant 0 : i32
    %c0_i32_1 = arith.constant 0 : i32
    %c0_i32_2 = arith.constant 0 : i32
    return %c0_i32, %c0_i32_0, %c0_i32_1 : i32, i32, i32
  }
  func.func @transform_2(%arg0: i32, %arg1: i32, %arg2: i32) -> (i32, i32, i32) {
    %c0_i32 = arith.constant 0 : i32
    %c0_i32_0 = arith.constant 0 : i32
    %c0_i32_1 = arith.constant 0 : i32
    %c0_i32_2 = arith.constant 0 : i32
    return %c0_i32, %c0_i32_0, %c0_i32_1 : i32, i32, i32
  }
  func.func @transform_3(%arg0: i32, %arg1: i32, %arg2: i32) -> (i32, i32) {
    %c0_i32 = arith.constant 0 : i32
    %c0_i32_0 = arith.constant 0 : i32
    %c0_i32_1 = arith.constant 0 : i32
    return %c0_i32, %c0_i32_0 : i32, i32
  }
  func.func @transform_4(%arg0: i32, %arg1: i32, %arg2: i32) -> (i32, i32, i32) {
    %c0_i32 = arith.constant 0 : i32
    %c0_i32_0 = arith.constant 0 : i32
    return %arg0, %arg1, %c0_i32 : i32, i32, i32
  }
}

</mosaic_0001>

<bundles_post_ra>
// kernel: tpu_custom_call.1
= control target key start
LH: loop header
LB: loop body
LE: loop exit
PB: predicated region body
PF: predicated region fallthrough
CT: control target
= control target key end

     0   :  { %s1932_s0 = inlined_call_operand.hbm [shape: bf16[2,16,128], index: 0, kind: input, shape index: {}]   ;;  %s1933_s1 = inlined_call_operand.hbm [shape: bf16[2,128,384], index: 1, kind: input, shape index: {}]   ;;  %s1934_s2 = inlined_call_operand.hbm [shape: bf16[2,128,128], index: 2, kind: input, shape index: {}]   ;;  %s1935_s3 = inlined_call_operand.vmem [shape: f32[1,128], index: 3, kind: input, shape index: {}]   ;;  %s1936_s4 = inlined_call_operand.hbm [shape: f32[2,16,128], index: 4, kind: output, shape index: {}]  }
   0x1   :  { %1944 = sst [smem:[#allocation13_spill]] %s1933_s1 }
   0x2   :  { %9 = vsyncpa [#allocation3], 0 }
   0x3   :  { %11 = vsyncpa [#allocation3 + $0x1], 0 }
   0x4   :  { %12 = vsyncpa [#allocation6], 0 }
   0x5   :  { %13 = vsyncpa [#allocation4], 0 }
   0x6   :  { %15 = vsyncpa [#allocation4 + $0x1], 0  ;;  %s1545_s15 = smov 0   ;;  %s1547_s16 = smov 0  }
   0x7   :  { %s1549_s17 = smov 0   ;;  %s1551_s18 = smov 0  }
   0x8   :  { %s1553_s19 = smov 0   ;;  %s1555_s20 = smov 0  }
   0x9   :  { %s1557_s21 = smov 0   ;;  %s1559_s22 = smov 0  }
   0xa LB: > { %s973_s23 = sadd.s32 4294967295, %s1505_s22   ;;  %s974_s24 = sadd.s32 4294967294, %s1505_s22   ;;  %s1505_s22 = sphi %s1559_s22, %s21_s22   ;;  %s1501_s21 = sphi %s1557_s21, %s1970_s21   ;;  %s1497_s20 = sphi %s1555_s20, %s1969_s20   ;;  %s1493_s19 = sphi %s1553_s19, %s1968_s19   ;;  %s1489_s18 = sphi %s1551_s18, %s1967_s18   ;;  %s1485_s17 = sphi %s1549_s17, %s1966_s17   ;;  %s1481_s16 = sphi %s1547_s16, %s1965_s16   ;;  %s1477_s15 = sphi %s1545_s15, %s1964_s15  }
   0xb   : > { %p60_p0 = scmp.ne.s32.totalorder %s1481_s16, %s1477_s15  ;;  %p1589_p1 = scmp.eq.s32.totalorder %s973_s23, 0 }
   0xc   : > { %p1593_p2 = scmp.eq.s32.totalorder %s973_s23, 3  ;;  %p155_p3 = scmp.eq.s32.totalorder %s974_s24, 3 }
   0xd   : > { %s1945_s25 = scalar_select %p1589_p1, 1, 0 }
   0xe   : > { %s1946_s26 = scalar_select %p1593_p2, 1, 0 }
   0xf   : > { %p1599_p4 = por %p1589_p1, %p60_p0  ;;  %p975_p5 = scmp.ge.s32.totalorder %s1505_s22, 1 }
  0x10   : > { %p1604_p6 = por %p155_p3, %p60_p0  ;;  %p162_p7 = scmp.lt.s32.totalorder %s1505_s22, 5 }
  0x11   : > { %s1947_s27 = scalar_select %p1599_p4, 1, 0 }
  0x12   : > { %s1948_s28 = scalar_select %p1604_p6, 1, 0 }
  0x13   : > { %p1609_p8 = pnand %p975_p5, %p162_p7  ;;  %s1507_s30 = smov [#allocation5]  }
  0x14   : > { %1949 = sst [smem:[#allocation12_spill]] %s1948_s28  ;;  %s174_s5 = sshll.u32 %s1507_s30, 4  ;;  %s175_s5 = int_to_ptr.vmem [resolvable:$true] %s174_s5 }
  0x15   : > { %s1950_s29 = scalar_select %p1609_p8, 1, 0 }
  0x16   : > { %p1180_p9 = pneg %p1609_p8  ;;  %s1508_s7 = smov [#allocation7]  }
  0x17   : > { %s187_s8 = sshll.u32 %s1508_s7, 4  ;;  %s1952_s1 = sld [smem:[#allocation13_spill]]  ;;  %s1621_s8 = int_to_ptr.vmem [resolvable:$true] %s187_s8 }
  0x18   : > { %p1617_p10 = pnand %p1180_p9, %p1589_p1 }
  0x1a   : > { %p1319_p12 = pneg %p1617_p10 }
  0x1d   : > { %s1317_s11 = scalar_lea.hbm %s1952_s1, 6144 }
  0x1e   : > { %p1318_p11 = scmp.ne.s32.totalorder %s1952_s1, %s1317_s11  ;;  %p1324_p3 = scmp.lt.u32.totalorder %s1317_s11, %s1952_s1 }
  0x20   : > { %p1320_p13 = pnand %p1319_p12, %p1318_p11 }
  0x22   : > { %p1321_p0 = pneg %p1320_p13 }
  0x24   : > { %p1326_p5 = pnand %p1324_p3, %p1321_p0 }
  0x26   : > { %1329 = shalt.err (!%p1326_p5)
}
  0x27   : > { %s1330_s24 = scalar_lea.vmem %s175_s5, 6144  ;;  %p1338_p1 = scmp.lt.s32.totalorder %s175_s5, %s175_s5 }
  0x28   : > { %p1331_p7 = scmp.ne.s32.totalorder %s175_s5, %s1330_s24  ;;  %p1339_p4 = scmp.lt.s32.totalorder %s1330_s24, %s1330_s24 }
  0x2a   : > { %p1333_p9 = pnand %p1331_p7, %p1319_p12  ;;  %p1340_p8 = por %p1339_p4, %p1338_p1 }
  0x2c   : > { %p1334_p6 = pneg %p1333_p9 }
  0x2e   : > { %p1341_p2 = pnand %p1340_p8, %p1334_p6 }
  0x30   : > { %1344 = shalt.err (!%p1341_p2)
}
  0x31   : > { %s1509_s30 = smov 192   ;;  %s1510_s7 = smov 12  }
  0x32   : > { %1183 = dma.hbm_to_vmem [thread:$0]  (!%p1617_p10), %s1952_s1, 6144, %s175_s5, [#allocation6], %s1509_s30, %s1509_s30, %s1510_s7  }
  0x33   : > { %s1345_s13 = scalar_lea.hbm %s1934_s2, 2048 }
  0x34   : > { %p1346_p11 = scmp.ne.s32.totalorder %s1934_s2, %s1345_s13  ;;  %p1352_p4 = scmp.lt.u32.totalorder %s1345_s13, %s1934_s2 }
  0x36   : > { %p1348_p1 = pnand %p1346_p11, %p1319_p12 }
  0x38   : > { %p1349_p2 = pneg %p1348_p1 }
  0x3a   : > { %p1354_p6 = pnand %p1352_p4, %p1349_p2 }
  0x3c   : > { %1357 = shalt.err (!%p1354_p6)
}
  0x3d   : > { %s1358_s5 = scalar_lea.vmem %s1621_s8, 2048  ;;  %p1366_p3 = scmp.lt.s32.totalorder %s1621_s8, %s1621_s8 }
  0x3e   : > { %p1359_p8 = scmp.ne.s32.totalorder %s1621_s8, %s1358_s5  ;;  %p1367_p5 = scmp.lt.s32.totalorder %s1358_s5, %s1358_s5 }
  0x40   : > { %p1361_p13 = pnand %p1359_p8, %p1319_p12  ;;  %p1368_p7 = por %p1367_p5, %p1366_p3 }
  0x42   : > { %p1362_p0 = pneg %p1361_p13 }
  0x44   : > { %p1369_p9 = pnand %p1368_p7, %p1362_p0 }
  0x46   : > { %1372 = shalt.err (!%p1369_p9)
}
  0x47   : > { %s1942_s28 = smov 64   ;;  %s1943_s30 = smov 4  }
  0x48   : > { %1186 = dma.hbm_to_vmem [thread:$0]  (!%p1617_p10), %s1934_s2, 2048, %s1621_s8, [#allocation6], %s1942_s28, %s1942_s28, %s1943_s30  }
  0x49   : > { %s33_s10 = sadd.s32 1, %s1497_s20  ;;  %s40_s11 = sadd.s32 1, %s1501_s21 }
  0x4a   : > { %p34_p12 = scmp.ge.s32.totalorder %s33_s10, 2  ;;  %s47_s12 = sadd.s32 1, %s1485_s17 }
  0x4b   : > { %p54_p11 = scmp.ne.s32.totalorder %s1485_s17, %s1481_s16  ;;  %p55_p1 = scmp.eq.s32.totalorder %s1505_s22, 0 }
  0x4c   : > { %s1972_s10 = smov (%p34_p12, %s33_s10), 0  ;;  %s1974_s11 = smov (!%p34_p12, %s40_s11), %s1501_s21 }
  0x4d   : > { %p1682_p2 = por %p55_p1, %p54_p11  ;;  %p1954_p4 = scmp.ne.s32.totalorder %s1946_s26, 0 }
  0x4e   : > { %p42_p10 = scmp.ge.s32.totalorder %s1974_s11, 2  ;;  %p1197_p8 = scmp.lt.s32.totalorder %s1505_s22, 4 }
  0x4f   : > { %p1688_p6 = por %p1954_p4, %p54_p11  ;;  %s204_s8 = sand.u32 1, %s1485_s17  }
  0x50   : > { %s1032_s14 = sshll.u32 %s1501_s21, 7  ;;  %s1976_s11 = smov (%p42_p10, %s1974_s11), 0 }
  0x51   : > { %s979_s23 = sshll.u32 %s204_s8, 3  ;;  %s44_s24 = ssub.s32 %s1501_s21, %s1976_s11 }
  0x52   : > { %p45_p13 = scmp.eq.s32.totalorder %s44_s24, 0  ;;  %s1702_s9 = scalar_lea.hbm %s1932_s0, %s1032_s14 }
  0x53   : > { %s208_s26 = scalar_lea.vmem [#allocation2], %s979_s23  ;;  %p1706_p0 = pnand %p1197_p8, %p1682_p2 }
  0x54   : > { %s215_s28 = sshll.u32 %s208_s26, 4  ;;  %s1715_s24 = scalar_lea.sflag [#allocation3], %s204_s8  ;;  %s1713_s28 = int_to_ptr.vmem [resolvable:$true] %s215_s28 }
  0x55   : > { %s1711_s1 = scalar_select %p45_p13, %s1485_s17, %s47_s12  }
  0x56   : > { %s1373_s14 = scalar_lea.hbm %s1702_s9, 128  ;;  %p1375_p5 = pneg %p1706_p0 }
  0x57   : > { %p1374_p3 = scmp.ne.s32.totalorder %s1702_s9, %s1373_s14  ;;  %s1378_s5 = scalar_lea.hbm %s1932_s0, 256 }
  0x58   : > { %p1379_p12 = scmp.lt.u32.totalorder %s1702_s9, %s1932_s0  ;;  %p1380_p11 = scmp.lt.u32.totalorder %s1378_s5, %s1373_s14 }
  0x59   : > { %p1376_p7 = pnand %p1375_p5, %p1374_p3  ;;  %p1382_p2 = scmp.lt.u32.totalorder %s1373_s14, %s1702_s9 }
  0x5a   : > { %p1381_p1 = por %p1380_p11, %p1379_p12 }
  0x5b   : > { %p1377_p9 = pneg %p1376_p7 }
  0x5c   : > { %p1383_p4 = por %p1382_p2, %p1381_p1 }
  0x5e   : > { %p1384_p10 = pnand %p1383_p4, %p1377_p9 }
  0x60   : > { %1387 = shalt.err (!%p1384_p10)
}
  0x61   : > { %s1388_s12 = scalar_lea.vmem %s1713_s28, 128  ;;  %s1513_s8 = smov [#allocation2]  }
  0x62   : > { %p1389_p8 = scmp.ne.s32.totalorder %s1713_s28, %s1388_s12  ;;  %s1393_s6 = sshll.u32 %s1513_s8, 4  ;;  %s1394_s6 = int_to_ptr.vmem [resolvable:$false] %s1393_s6 }
  0x63   : > { %s1395_s23 = scalar_lea.vmem %s1394_s6, 256  ;;  %p1396_p7 = scmp.lt.s32.totalorder %s1713_s28, %s1394_s6 }
  0x64   : > { %p1391_p13 = pnand %p1389_p8, %p1375_p5  ;;  %p1397_p12 = scmp.lt.s32.totalorder %s1395_s23, %s1388_s12 }
  0x66   : > { %p1392_p3 = pneg %p1391_p13  ;;  %p1398_p11 = por %p1397_p12, %p1396_p7 }
  0x68   : > { %p1399_p1 = pnand %p1398_p11, %p1392_p3 }
  0x6a   : > { %1402 = shalt.err (!%p1399_p1)
}
  0x6b   : > { %s1957_s14 = smov 4   ;;  %s1958_s5 = smov 64  }
  0x6c   : > { %1190 = dma.hbm_to_vmem [thread:$0]  (!%p1706_p0), %s1702_s9, 128, %s1713_s28, %s1715_s24, %s1958_s5, %s1958_s5, %s1957_s14  }
  0x6d   : > { %p1959_p5 = scmp.ne.s32.totalorder %s1950_s29, 0 }
  0x6e   : > { %s1749_s7 = sand.u32 (!%p1959_p5), 1, %s1481_s16   ;;  %p1960_p9 = scmp.ne.s32.totalorder (!%p1959_p5), %s1947_s27, 0 }
  0x6f   : > { %227 = sbr.rel (%p1959_p5) target bundleno = 1389 (0x56d), region = 36  ;;  %s983_s26 = sshll.u32 (!%p1959_p5), %s1749_s7, 3 }
  0x70   : > { %s230_s12 = scalar_lea.sflag (!%p1959_p5), [#allocation3], %s1749_s7  ;;  %s1753_s8 = scalar_lea.vmem (!%p1959_p5), [#allocation2], %s983_s26 }
  0x76   : > { %1464 = dma.done.wait (%p1960_p9), %s230_s12, 128  }
  0x77   : > { %1466 = vsyncadd (%p1960_p9), %s230_s12, 4294967168  ;;  %p1961_p0 = scmp.ne.s32.totalorder %s1945_s25, 0 }
  0x79   : > { %1468 = dma.done.wait (%p1961_p0), [#allocation6], 8192  }
  0x7a   : > { %1470 = vsyncadd (%p1961_p0), [#allocation6], 4294959104  ;;  %s986_s29 = sshll.u32 %s1749_s7, 4  ;;  %p987_p2 = scmp.ne.s32.totalorder %s1489_s18, 0 }
  0x7b   : > { %s1764_s28 = scalar_lea.vmem [#allocation8], %s986_s29  ;;  %v1514_v0 = vmov (!%p987_p2), 0.0  }
  0x7c   : > { %271 = sbr.rel (%p987_p2) target bundleno = 131 (0x83), region = 52  ;;  %272 = vst [vmem:[%s1764_s28] sm:$0xff] (!%p987_p2), %v1514_v0  ;;  %273 = vst [vmem:[%s1764_s28 + $0x8] sm:$0xff] (!%p987_p2), %v1514_v0 }
  0x83 PF: > { %s1034_s27 = smul.u32 192, %s1489_s18  ;;  %v1515_v1 = vmov 0.0   ;;  %vm1516_vm0 = vmmov 0   ;;  %v1291_v18 = vld [vmem:[%s1753_s8] sm:$0xff]   ;;  %vm663_vm1 = vcmask 130048   ;;  %s1033_s30 = sshll.u32 %s1489_s18, 6 }
  0x84   : > { %1096 = vmatprep.subr.bf16.mxu1 %v1515_v1  ;;  %1076 = vmatprep.subr.bf16.mxu0 %v1515_v1  ;;  %s1839_s9 = scalar_lea.vmem [#allocation7], %s1033_s30  ;;  %p1025_p4 = scmp.ne.s32.totalorder %s1489_s18, 1 }
  0x85   : > { %1112 = vmatprep.mubr.msk.bf16.mxu1 %vm1516_vm0, %v1515_v1  ;;  %1092 = vmatprep.mubr.msk.bf16.mxu0 %vm1516_vm0, %v1515_v1  ;;  %s1776_s25 = scalar_lea.vmem [#allocation5], %s1034_s27  ;;  %v1301_v0 = vld [vmem:[%s1839_s9] sm:$0xff]  }
  0x86   : > { %v1276_v2 = vld [vmem:[%s1776_s25 + $0x4] ss:$12 sps:$4 sm:$0xff]   ;;  %v1277_v3 = vld [vmem:[%s1776_s25 + $0x1c] ss:$12 sps:$4 sm:$0xff]   ;;  %v1278_v4 = vld [vmem:[%s1776_s25] ss:$12 sps:$4 sm:$0xff]  }
  0x87   : > { %1097 = vmatpush3.bf16.msra.mxu1 %v1276_v2  ;;  %1077 = vmatpush3.bf16.msra.mxu0 %v1278_v4  ;;  %v1280_v5 = vld [vmem:[%s1776_s25 + $0x18] ss:$12 sps:$4 sm:$0xff]   ;;  %v1279_v6 = vld [vmem:[%s1776_s25 + $0x34] ss:$12 sps:$4 sm:$0xff]   ;;  %v1282_v7 = vld [vmem:[%s1776_s25 + $0x30] ss:$12 sps:$4 sm:$0xff]  }
  0x88   : > { %1098 = vmatprep.subr.bf16.mxu1 %v1515_v1  ;;  %1078 = vmatprep.subr.bf16.mxu0 %v1515_v1  ;;  %v1281_v8 = vld [vmem:[%s1776_s25 + $0x4c] ss:$12 sps:$4 sm:$0xff]   ;;  %v1284_v9 = vld [vmem:[%s1776_s25 + $0x48] ss:$12 sps:$4 sm:$0xff]   ;;  %v1283_v10 = vld [vmem:[%s1776_s25 + $0x64] ss:$12 sps:$4 sm:$0xff]  }
  0x89   : > { %v1286_v11 = vld [vmem:[%s1776_s25 + $0x60] ss:$12 sps:$4 sm:$0xff]   ;;  %v1285_v12 = vld [vmem:[%s1776_s25 + $0x7c] ss:$12 sps:$4 sm:$0xff]   ;;  %v1288_v13 = vld [vmem:[%s1776_s25 + $0x78] ss:$12 sps:$4 sm:$0xff]  }
  0x8a   : > { %v1287_v14 = vld [vmem:[%s1776_s25 + $0x94] ss:$12 sps:$4 sm:$0xff]   ;;  %v1290_v15 = vld [vmem:[%s1776_s25 + $0x90] ss:$12 sps:$4 sm:$0xff]   ;;  %v1289_v16 = vld [vmem:[%s1776_s25 + $0xac] ss:$12 sps:$4 sm:$0xff]  }
  0x8b   : > { %1099 = vmatpush3.bf16.msra.mxu1 %v1277_v3  ;;  %1079 = vmatpush3.bf16.msra.mxu0 %v1280_v5  ;;  %v1292_v17 = vld [vmem:[%s1776_s25 + $0xa8] ss:$12 sps:$4 sm:$0xff]   ;;  %v1294_v20 = vld [vmem:[%s1776_s25 + $0x20] ss:$12 sps:$4 sm:$0xff]   ;;  %v1295_v21 = vld [vmem:[%s1776_s25 + $0x38] ss:$12 sps:$4 sm:$0xff]  }
  0x8c   : > { %1100 = vmatprep.subr.bf16.mxu1 %v1515_v1  ;;  %1080 = vmatprep.subr.bf16.mxu0 %v1515_v1  ;;  %v1293_v19 = vld [vmem:[%s1776_s25 + $0x8] ss:$12 sps:$4 sm:$0xff]   ;;  %v1296_v22 = vld [vmem:[%s1776_s25 + $0x50] ss:$12 sps:$4 sm:$0xff]   ;;  %v1298_v24 = vld [vmem:[%s1776_s25 + $0x80] ss:$12 sps:$4 sm:$0xff]  }
  0x8d   : > { %v1297_v23 = vld [vmem:[%s1776_s25 + $0x68] ss:$12 sps:$4 sm:$0xff]   ;;  %v1299_v25 = vld [vmem:[%s1776_s25 + $0x98] ss:$12 sps:$4 sm:$0xff]   ;;  %v1300_v26 = vld [vmem:[%s1776_s25 + $0xb0] ss:$12 sps:$4 sm:$0xff]  }
  0x8e   : > { %v1302_v3 = vld [vmem:[%s1839_s9 + $0x8] sm:$0xff]   ;;  %v1303_v4 = vld [vmem:[%s1839_s9 + $0x10] sm:$0xff]   ;;  %v1304_v5 = vld [vmem:[%s1839_s9 + $0x18] sm:$0xff]  }
  0x8f   : > { %1101 = vmatpush3.bf16.msra.mxu1 %v1279_v6  ;;  %1081 = vmatpush3.bf16.msra.mxu0 %v1282_v7  ;;  %v1305_v6 = vld [vmem:[%s1839_s9 + $0x20] sm:$0xff]   ;;  %v1306_v7 = vld [vmem:[%s1839_s9 + $0x28] sm:$0xff]  }
  0x90   : > { %1102 = vmatprep.subr.bf16.mxu1 %v1515_v1  ;;  %1082 = vmatprep.subr.bf16.mxu0 %v1515_v1 }
  0x93   : > { %1103 = vmatpush3.bf16.msra.mxu1 %v1281_v8  ;;  %1083 = vmatpush3.bf16.msra.mxu0 %v1284_v9  ;;  %v1307_v8 = vld [vmem:[%s1839_s9 + $0x30] sm:$0xff]   ;;  %v1308_v9 = vld [vmem:[%s1839_s9 + $0x38] sm:$0xff]  }
  0x94   : > { %1104 = vmatprep.subr.bf16.mxu1 %v1515_v1  ;;  %1084 = vmatprep.subr.bf16.mxu0 %v1515_v1 }
  0x97   : > { %1105 = vmatpush3.bf16.msra.mxu1 %v1283_v10  ;;  %1085 = vmatpush3.bf16.msra.mxu0 %v1286_v11 }
  0x98   : > { %1106 = vmatprep.subr.bf16.mxu1 %v1515_v1  ;;  %1086 = vmatprep.subr.bf16.mxu0 %v1515_v1 }
  0x9b   : > { %1107 = vmatpush3.bf16.msra.mxu1 %v1285_v12  ;;  %1087 = vmatpush3.bf16.msra.mxu0 %v1288_v13 }
  0x9c   : > { %1108 = vmatprep.subr.bf16.mxu1 %v1515_v1  ;;  %1088 = vmatprep.subr.bf16.mxu0 %v1515_v1 }
  0x9f   : > { %1109 = vmatpush3.bf16.msra.mxu1 %v1287_v14  ;;  %1089 = vmatpush3.bf16.msra.mxu0 %v1290_v15  ;;  %v821_v15 = vld [vmem:[%s1764_s28] sm:$0xff] }
  0xa0   : > { %1110 = vmatprep.subr.bf16.mxu1 %v1515_v1  ;;  %1090 = vmatprep.subr.bf16.mxu0 %v1515_v1 }
  0xa3   : > { %1111 = vmatpush3.bf16.msra.mxu1 %v1289_v16  ;;  %1091 = vmatpush3.bf16.msra.mxu0 %v1292_v17  ;;  %v822_v17 = vld [vmem:[%s1764_s28 + $0x8] sm:$0xff] }
  0xa4   : > { %1142 = vmatprep.subr.bf16.mxu1 %v1515_v1  ;;  %1116 = vmatprep.subr.bf16.mxu0 %v1515_v1 }
  0xa6   : > { %1113 = vmatmul.mubr.bf16.vlgmr.msra.gmra.mrb[0].mxu1 %v1291_v18  ;;  %1093 = vmatmul.mubr.bf16.vlgmr.msra.gmra.mrb[0].mxu0 %v1291_v18 }
  0xa7   : > { %1144 = vmatprep.mubr.msk.bf16.mxu1 %vm1516_vm0, %v1515_v1  ;;  %1117 = vmatpush3.bf16.msra.mxu0 %v1293_v19 }
  0xa8   : > { %1132 = vmatprep.mubr.msk.bf16.mxu0 %vm1516_vm0, %v1515_v1  ;;  %1118 = vmatprep.subr.bf16.mxu0 %v1515_v1 }
  0xab   : > { %1119 = vmatpush3.bf16.msra.mxu0 %v1294_v20 }
  0xac   : > { %1120 = vmatprep.subr.bf16.mxu0 %v1515_v1 }
  0xaf   : > { %1121 = vmatpush3.bf16.msra.mxu0 %v1295_v21 }
  0xb0   : > { %1122 = vmatprep.subr.bf16.mxu0 %v1515_v1 }
  0xb3   : > { %1123 = vmatpush3.bf16.msra.mxu0 %v1296_v22 }
  0xb4   : > { %1124 = vmatprep.subr.bf16.mxu0 %v1515_v1 }
  0xb7   : > { %1125 = vmatpush3.bf16.msra.mxu0 %v1297_v23  ;;  %v1026_v23 = vld [vmem:[%s1935_s3] ss:$0 sm:$0xff] (!%p1025_p4) }
  0xb8   : > { %1126 = vmatprep.subr.bf16.mxu0 %v1515_v1 }
  0xbb   : > { %1127 = vmatpush3.bf16.msra.mxu0 %v1298_v24 }
  0xbc   : > { %1128 = vmatprep.subr.bf16.mxu0 %v1515_v1 }
  0xbf   : > { %1129 = vmatpush3.bf16.msra.mxu0 %v1299_v25 }
  0xc0   : > { %1130 = vmatprep.subr.bf16.mxu0 %v1515_v1 }
  0xc3   : > { %1131 = vmatpush3.bf16.msra.mxu0 %v1300_v26 }
  0xc4   : > { %1136 = vmatprep.subr.bf16.mxu0 %v1515_v1 }
  0xc6   : > { %1133 = vmatmul.mubr.bf16.vlgmr.msra.gmra.mrb[4].mxu0 %v1291_v18 }
  0xc7   : > { %1138 = vmatprep.mubr.msk.bf16.mxu0 %vm1516_vm0, %v1515_v1 }
 0x179   : > { %v508_v27 = vpop.f32.mrb[0].mxu1  ;;  %v402_v30 = vpop.f32.mrb[0].mxu0 }
 0x17a   : > { %v1114_v28 = vpop.f32.mrb[1].mxu1  ;;  %v1094_v33 = vpop.f32.mrb[1].mxu0 }
 0x17b   : > { %v511_v29 = vpop.f32.mrb[2].mxu1  ;;  %v405_v34 = vpop.f32.mrb[2].mxu0 }
 0x17c   : > { %v515_v31 = vpack.c.bf16 %v511_v29, %v508_v27  ;;  %v1115_v32 = vpop.f32.mrb[3].mxu1  ;;  %v409_v35 = vpack.c.bf16 %v405_v34, %v402_v30  ;;  %v1095_v36 = vpop.f32.mrb[3].mxu0 }
 0x17e   : > { %1137 = vmatpush3.bf16.xpose.msra.mxu0 %v515_v31 }
 0x185   : > { %1139 = vmatmul.mubr.bf16.vlgmr.msra.gmra.mrb[8].mxu0 %v409_v35 }
 0x199   : > { %v614_v37 = vpop.f32.mrb[4].mxu0 }
 0x19a   : > { %v1134_v38 = vpop.f32.mrb[5].mxu0 }
 0x19b   : > { %v617_v39 = vpop.f32.mrb[6].mxu0 }
 0x19c   : > { %v621_v40 = vpack.c.bf16 %v617_v39, %v614_v37  ;;  %v1135_v41 = vpop.f32.mrb[7].mxu0 }
 0x19e   : > { %1143 = vmatpush3.bf16.msra.mxu1 %v621_v40 }
 0x19f   : > { %1148 = vmatprep.subr.bf16.mxu1 %v1515_v1 }
 0x258   : > { %v656_v42 = vpop.f32.mrb[8].mxu0 }
 0x259   : > { %v1140_v43 = vpop.f32.mrb[9].mxu0  ;;  %v664_v44 = vsel %vm663_vm1, %v656_v42, -inf }
 0x25a   : > { %665 = vmax.xlane.f32.xlu0 %v664_v44  ;;  %v659_v45 = vpop.f32.mrb[10].mxu0 }
 0x25b   : > { %v1141_v46 = vpop.f32.mrb[11].mxu0  ;;  %v667_v47 = vsel %vm663_vm1, %v659_v45, -inf }
 0x25e   : > { %668 = vmax.xlane.f32.xlu0 %v667_v47 }
 0x2e7   : > { %v666_v48 = vpop.xlane.xlu0 %665 }
 0x2e8   : > { %v670_v49 = vsub.f32 %v656_v42, %v666_v48 }
 0x2ea   : > { %v672_v50 = vmul.f32 1.442695, %v670_v49 }
 0x2eb   : > { %v669_v51 = vpop.xlane.xlu0 %668 }
 0x2ec   : > { %1309 = vpow2.f32 %v672_v50  ;;  %v671_v52 = vsub.f32 %v659_v45, %v669_v51 }
 0x2ee   : > { %v674_v53 = vmul.f32 1.442695, %v671_v52 }
 0x2f0   : > { %1311 = vpow2.f32 %v674_v53 }
 0x2f6   : > { %v1310_v54 = vpop.eup %1309 }
 0x2f7   : > { %v676_v55 = vsel %vm663_vm1, %v1310_v54, 0.0 }
 0x2f8   : > { %677 = vadd.xlane.f32.xlu1 %v676_v55 }
 0x2fa   : > { %v1312_v56 = vpop.eup %1311 }
 0x2fb   : > { %v679_v57 = vsel %vm663_vm1, %v1312_v56, 0.0 }
 0x2fc   : > { %680 = vadd.xlane.f32.xlu1 %v679_v57 }
 0x385   : > { %v678_v58 = vpop.xlane.xlu1 %677 }
 0x386   : > { %1313 = vrcp.f32 %v678_v58 }
 0x389   : > { %v681_v59 = vpop.xlane.xlu1 %680 }
 0x38a   : > { %1315 = vrcp.f32 %v681_v59 }
 0x390   : > { %v1314_v60 = vpop.eup %1313 }
 0x391   : > { %v684_v62 = vmul.f32 %v1314_v60, %v1310_v54 }
 0x394   : > { %v1316_v61 = vpop.eup %1315 }
 0x395   : > { %v685_v63 = vmul.f32 %v1316_v61, %v1312_v56 }
 0x397   : > { %v686_v2 = vpack.c.bf16 %v685_v63, %v684_v62 }
 0x399   : > { %1145 = vmatmul.mubr.msk.bf16.vlgmr.msra.gmra.mrb[4].mxu1 %vm663_vm1, %v686_v2 }
 0x39a   : > { %1149 = vmatpush3.bf16.msra.mxu1 %v1301_v0  ;;  %1164 = vmatprep.mubr.msk.bf16.mxu1 %vm1516_vm0, %v1515_v1 }
 0x39b   : > { %1150 = vmatprep.subr.bf16.mxu1 %v1515_v1 }
 0x39e   : > { %1151 = vmatpush3.bf16.msra.mxu1 %v1302_v3 }
 0x39f   : > { %1152 = vmatprep.subr.bf16.mxu1 %v1515_v1 }
 0x3a2   : > { %1153 = vmatpush3.bf16.msra.mxu1 %v1303_v4 }
 0x3a3   : > { %1154 = vmatprep.subr.bf16.mxu1 %v1515_v1 }
 0x3a6   : > { %1155 = vmatpush3.bf16.msra.mxu1 %v1304_v5 }
 0x3a7   : > { %1156 = vmatprep.subr.bf16.mxu1 %v1515_v1 }
 0x3aa   : > { %1157 = vmatpush3.bf16.msra.mxu1 %v1305_v6 }
 0x3ab   : > { %1158 = vmatprep.subr.bf16.mxu1 %v1515_v1 }
 0x3ae   : > { %1159 = vmatpush3.bf16.msra.mxu1 %v1306_v7 }
 0x3af   : > { %1160 = vmatprep.subr.bf16.mxu1 %v1515_v1 }
 0x3b2   : > { %1161 = vmatpush3.bf16.msra.mxu1 %v1307_v8 }
 0x3b3   : > { %1162 = vmatprep.subr.bf16.mxu1 %v1515_v1 }
 0x3b6   : > { %1163 = vmatpush3.bf16.msra.mxu1 %v1308_v9 }
 0x46c   : > { %v724_v10 = vpop.f32.mrb[4].mxu1 }
 0x46d   : > { %v1146_v11 = vpop.f32.mrb[5].mxu1 }
 0x46e   : > { %v727_v12 = vpop.f32.mrb[6].mxu1 }
 0x46f   : > { %v731_v13 = vpack.c.bf16 %v727_v12, %v724_v10  ;;  %v1147_v14 = vpop.f32.mrb[7].mxu1 }
 0x471   : > { %1165 = vmatmul.mubr.bf16.vlgmr.msra.gmra.mrb[8].mxu1 %v731_v13 }
 0x543   : > { %830 = sbr.rel (%p1025_p4) target bundleno = 1364 (0x554), region = 56 }
 0x544   : > { %v814_v16 = vpop.f32.mrb[8].mxu1 }
 0x545   : > { %v823_v18 = vadd.f32 %v821_v15, %v814_v16  ;;  %v1166_v19 = vpop.f32.mrb[9].mxu1 }
 0x546   : > { %v817_v20 = vpop.f32.mrb[10].mxu1 }
 0x547   : > { %825 = vst [vmem:[%s1764_s28] sm:$0xff] %v823_v18  ;;  %v824_v21 = vadd.f32 %v822_v17, %v817_v20  ;;  %v1167_v22 = vpop.f32.mrb[11].mxu1 }
 0x549   : > { %826 = vst [vmem:[%s1764_s28 + $0x8] sm:$0xff] %v824_v21 }
 0x54e   : > { %v831_v1 = vld [vmem:[%s1764_s28] sm:$0xff] }
 0x54f   : > { %v840_v25 = vadd.f32 %v1026_v23, %v831_v1 }
 0x550   : > { %v832_v24 = vld [vmem:[%s1764_s28 + $0x8] sm:$0xff] }
 0x551   : > { %v841_v26 = vadd.f32 %v1026_v23, %v832_v24  ;;  %842 = vst [vmem:[%s1764_s28] sm:$0xff] %v840_v25 }
 0x553   : > { %843 = vst [vmem:[%s1764_s28 + $0x8] sm:$0xff] %v841_v26 }
 0x554 PF: > { %s1035_s18 = sshll.u32 %s1493_s19, 8  ;;  %s860_s26 = sshll.u32 %s1764_s28, 4  ;;  %s1878_s26 = int_to_ptr.vmem [resolvable:$true] %s860_s26 }
 0x555   : > { %s1875_s5 = scalar_lea.hbm %s1936_s4, %s1035_s18  ;;  %s845_s12 = scalar_lea.sflag [#allocation4], %s1749_s7 }
 0x556   : > { %s1403_s8 = scalar_lea.vmem %s1878_s26, 256  ;;  %s1517_s29 = smov [#allocation8]  }
 0x557   : > { %p1404_p10 = scmp.ne.s32.totalorder %s1878_s26, %s1403_s8  ;;  %s1407_s27 = sshll.u32 %s1517_s29, 4  ;;  %s1408_s27 = int_to_ptr.vmem [resolvable:$false] %s1407_s27 }
 0x558   : > { %s1409_s19 = scalar_lea.vmem %s1408_s27, 512  ;;  %p1410_p3 = scmp.lt.s32.totalorder %s1878_s26, %s1408_s27 }
 0x559   : > { %p1405_p8 = pnand %p1404_p10, %p1688_p6  ;;  %p1411_p7 = scmp.lt.s32.totalorder %s1409_s19, %s1403_s8 }
 0x55b   : > { %p1406_p13 = pneg %p1405_p8  ;;  %p1412_p12 = por %p1411_p7, %p1410_p3 }
 0x55d   : > { %p1413_p11 = pnand %p1412_p12, %p1406_p13 }
 0x55f   : > { %1416 = shalt.err (!%p1413_p11)
}
 0x560   : > { %s1417_s28 = scalar_lea.hbm %s1875_s5, 256  ;;  %s1421_s9 = scalar_lea.hbm %s1936_s4, 512 }
 0x561   : > { %p1418_p1 = scmp.ne.s32.totalorder %s1875_s5, %s1417_s28  ;;  %p1422_p0 = scmp.lt.u32.totalorder %s1875_s5, %s1936_s4 }
 0x562   : > { %p1423_p2 = scmp.lt.u32.totalorder %s1421_s9, %s1417_s28  ;;  %p1425_p10 = scmp.lt.u32.totalorder %s1417_s28, %s1875_s5 }
 0x563   : > { %p1419_p5 = pnand %p1418_p1, %p1688_p6 }
 0x564   : > { %p1424_p4 = por %p1423_p2, %p1422_p0 }
 0x565   : > { %p1420_p9 = pneg %p1419_p5 }
 0x566   : > { %p1426_p8 = por %p1425_p10, %p1424_p4 }
 0x568   : > { %p1427_p13 = pnand %p1426_p8, %p1420_p9 }
 0x56a   : > { %1430 = shalt.err (!%p1427_p13)
}
 0x56b   : > { %s1518_s18 = smov 128   ;;  %s1519_s23 = smov 8  }
 0x56c   : > { %1178 = dma.vmem_to_hbm [thread:$0]  (%p1688_p6), %s1878_s26, 256, %s1875_s5, %s845_s12, %s1518_s18, %s1518_s18, %s1519_s23  }
 0x56d PF: > { %s1962_s14 = sld [smem:[#allocation12_spill]]  ;;  %p1200_p3 = scmp.ge.s32.totalorder %s1505_s22, 2 }
 0x56e   : > { %s875_s8 = sand.u32 1, %s1477_s15  }
 0x56f   : > { %s876_s29 = scalar_lea.sflag [#allocation4], %s875_s8 }
 0x573   : > { %p1963_p7 = scmp.ne.s32.totalorder %s1962_s14, 0 }
 0x575   : > { %p1192_p12 = pnand %p1200_p3, %p1963_p7 }
 0x577   : > { %1472 = dma.done.wait (!%p1192_p12), %s876_s29, 256  }
 0x578   : > { %1474 = vsyncadd (!%p1192_p12), %s876_s29, 4294967040  ;;  %s21_s22 = sadd.s32 1, %s1505_s22   ;;  %s1964_s15 = smov %s1481_s16 }
 0x579   : > { %p18_p11 = scmp.ge.s32.totalorder %s21_s22, 6   ;;  %s1965_s16 = smov %s1485_s17 }
 0x57a   : > { %s1966_s17 = smov %s1711_s1  ;;  %s1967_s18 = smov %s1497_s20 }
 0x57b   : > { %s1968_s19 = smov %s1501_s21  ;;  %s1969_s20 = smov %s1972_s10 }
 0x57c   : > { %s1970_s21 = smov %s1976_s11  ;;  %20 = sbr.rel (!%p18_p11) target bundleno = 10 (0xa), region = 99 }
 0x583   :  { %881 = vsyncpa [#allocation3], 1 }
 0x584   :  { %883 = vsyncpa [#allocation3 + $0x1], 1 }
 0x585   :  { %884 = vsyncpa [#allocation6], 1 }
 0x586   :  { %885 = vsyncpa [#allocation4], 1 }
 0x587   :  { %887 = vsyncpa [#allocation4 + $0x1], 1 }

</bundles_post_ra>
